<compile_context>
chip_gen: v6e
topology: v6e:2x2x1
jax: 0.10.0
libtpu: 0.0.40
codegen_flags: <defaults>
</compile_context>

<pallas_src>
import functools

import jax
import jax.numpy as jnp
from jax.experimental import pallas as pl
from jax.experimental.pallas import tpu as pltpu

_LANE = 128


def _stable_sigmoid(x):
    # Numerically stable sigmoid: one exp + one reciprocal per element.
    e = jnp.exp(-jnp.abs(x))
    s = 1.0 / (1.0 + e)                 # sigmoid(|x|)
    return jnp.where(x >= 0.0, s, 1.0 - s)


def _elem_index(shape):
    # Row-major linear element index for a (rows, 128) tile.
    r = jax.lax.broadcasted_iota(jnp.int32, shape, 0)
    c = jax.lax.broadcasted_iota(jnp.int32, shape, 1)
    return r * shape[1] + c


def _kto_kernel(pol_ref, refr_ref, klp_ref, rewards_ref, scalars_ref, *,
                beta, desirable_weight, undesirable_weight,
                n_chosen, n_rejected, n_kl, world_size):
    # ---- KL term: clamp(mean(policy_KL - reference_KL), 0) ----
    # KL slab layout: elements [0, n_kl) = policy_KL, [n_kl, 2*n_kl) = reference_KL,
    # remainder = exact zeros from padding, so no validity mask is needed.
    kl_tile = klp_ref[...]
    kl_sign = jnp.where(_elem_index(kl_tile.shape) < n_kl, 1.0, -1.0)
    kl = jnp.sum(kl_sign * kl_tile, keepdims=True)          # (1, 1)
    kl = kl / float(max(n_kl, 1) * world_size)
    kl = jnp.maximum(kl, 0.0)

    # ---- fused chosen + rejected pass ----
    # Slab layout: elements [0, n_chosen) = chosen, [n_chosen, n_chosen+n_rejected)
    # = rejected, remainder = padding.
    logr = pol_ref[...] - refr_ref[...]
    rewards_ref[...] = beta * logr                           # lane-dense rewards slab

    elem = _elem_index(logr.shape)
    is_chosen = elem < n_chosen
    is_rejected = jnp.logical_and(elem >= n_chosen, elem < (n_chosen + n_rejected))

    # chosen:   1 - sigmoid(beta*(logr - KL)) == sigmoid(-beta*(logr - KL))  -> sign = -1
    # rejected: 1 - sigmoid(beta*(KL - logr)) == sigmoid(+beta*(logr - KL))  -> sign = +1
    sign = jnp.where(is_chosen, -1.0, 1.0)
    wmask = jnp.where(is_chosen, desirable_weight,
                      jnp.where(is_rejected, undesirable_weight, 0.0))

    losses = _stable_sigmoid(sign * (beta * (logr - kl)))
    loss_mean = jnp.sum(wmask * losses, keepdims=True)       # (1, 1)
    loss_mean = loss_mean / float(max(n_chosen + n_rejected, 1))

    # Pack the two scalars into one lane-dense (1, 128) output: [0,0]=loss, [0,1]=KL.
    lane = jax.lax.broadcasted_iota(jnp.int32, (1, _LANE), 1)
    scalars_ref[...] = jnp.where(lane == 0, loss_mean,
                                 jnp.where(lane == 1, kl, 0.0))


def _pad_to_tile(x):
    """Pad a 1-D vector to a lane-dense (rows, 128) f32 tile (zeros in padding)."""
    x = x.astype(jnp.float32)
    n = x.shape[0]
    rows = max(1, -(-n // _LANE))
    x = jnp.pad(x, (0, rows * _LANE - n))
    return x.reshape(rows, _LANE)


def kto_loss(policy_chosen_logps,
             policy_rejected_logps,
             policy_KL_logps,
             reference_chosen_logps,
             reference_rejected_logps,
             reference_KL_logps,
             *,
             beta: float = 0.1,
             desirable_weight: float = 1.0,
             undesirable_weight: float = 1.0,
             world_size: int = 1):
    """JAX/Pallas equivalent of KTOLoss.forward (single replica).

    Returns (losses, chosen_rewards, rejected_rewards, KL) where `losses` and
    `KL` are scalars, matching the PyTorch module.
    """
    n_chosen = int(policy_chosen_logps.shape[0])
    n_rejected = int(policy_rejected_logps.shape[0])
    n_kl = int(policy_KL_logps.shape[0])

    # Pack 6 vectors -> 3 lane-dense slabs.
    pol = _pad_to_tile(jnp.concatenate(
        [policy_chosen_logps.astype(jnp.float32),
         policy_rejected_logps.astype(jnp.float32)], axis=0))
    refr = _pad_to_tile(jnp.concatenate(
        [reference_chosen_logps.astype(jnp.float32),
         reference_rejected_logps.astype(jnp.float32)], axis=0))
    klp = _pad_to_tile(jnp.concatenate(
        [policy_KL_logps.astype(jnp.float32),
         reference_KL_logps.astype(jnp.float32)], axis=0))

    kernel = functools.partial(
        _kto_kernel,
        beta=float(beta),
        desirable_weight=float(desirable_weight),
        undesirable_weight=float(undesirable_weight),
        n_chosen=n_chosen,
        n_rejected=n_rejected,
        n_kl=n_kl,
        world_size=int(world_size),
    )

    out_shape = (
        jax.ShapeDtypeStruct(pol.shape, jnp.float32),   # packed rewards slab
        jax.ShapeDtypeStruct((1, _LANE), jnp.float32),  # [loss, KL, 0, ...]
    )

    n_cr = int(pol.size)
    n_kl_pad = int(klp.size)
    cost = pl.CostEstimate(
        flops=20 * (n_cr + n_kl_pad),
        transcendentals=n_cr,
        bytes_accessed=4 * (3 * n_cr + n_kl_pad + _LANE),
    )

    vmem = pl.BlockSpec(memory_space=pltpu.MemorySpace.VMEM)

    rewards2, scalars2 = pl.pallas_call(
        kernel,
        out_shape=out_shape,
        in_specs=[vmem, vmem, vmem],
        out_specs=(vmem, vmem),
        cost_estimate=cost,
    )(pol, refr, klp)

    rewards_flat = rewards2.reshape(-1)
    chosen_rewards = rewards_flat[:n_chosen]
    rejected_rewards = rewards_flat[n_chosen:n_chosen + n_rejected]
    loss = scalars2[0, 0]
    KL = scalars2[0, 1]
    return loss, chosen_rewards, rejected_rewards, KL


def _reference(pc, pr, pkl, rc, rr, rkl, *, beta, dw, uw):
    KL = jnp.maximum(jnp.mean(pkl - rkl), 0.0)        # world_size == 1
    c_logr = pc - rc
    c_losses = 1.0 - jax.nn.sigmoid(beta * (c_logr - KL))
    c_rewards = beta * c_logr
    r_logr = pr - rr
    r_losses = 1.0 - jax.nn.sigmoid(beta * (KL - r_logr))
    r_rewards = beta * r_logr
    loss = jnp.mean(jnp.concatenate([dw * c_losses, uw * r_losses], axis=0))
    return loss, c_rewards, r_rewards, KL


if __name__ == "__main__":
    key = jax.random.PRNGKey(0)
    ks = jax.random.split(key, 6)

    n_chosen, n_rejected, n_kl = 4, 4, 8
    beta, dw, uw = 0.1, 1.33, 1.0

    # Log-probabilities are negative.
    pc = -jnp.abs(jax.random.normal(ks[0], (n_chosen,), jnp.float32)) - 1.0
    rc = -jnp.abs(jax.random.normal(ks[1], (n_chosen,), jnp.float32)) - 1.0
    pr = -jnp.abs(jax.random.normal(ks[2], (n_rejected,), jnp.float32)) - 1.0
    rr = -jnp.abs(jax.random.normal(ks[3], (n_rejected,), jnp.float32)) - 1.0
    pkl = -jnp.abs(jax.random.normal(ks[4], (n_kl,), jnp.float32)) - 1.0
    rkl = -jnp.abs(jax.random.normal(ks[5], (n_kl,), jnp.float32)) - 1.0

    loss, cr, rjr, kl = kto_loss(
        pc, pr, pkl, rc, rr, rkl,
        beta=beta, desirable_weight=dw, undesirable_weight=uw, world_size=1)
    jax.block_until_ready((loss, cr, rjr, kl))

    ref_loss, ref_cr, ref_rjr, ref_kl = _reference(
        pc, pr, pkl, rc, rr, rkl, beta=beta, dw=dw, uw=uw)

    assert jnp.allclose(loss, ref_loss, atol=1e-5, rtol=1e-5), (loss, ref_loss)
    assert jnp.allclose(cr, ref_cr, atol=1e-6, rtol=1e-6)
    assert jnp.allclose(rjr, ref_rjr, atol=1e-6, rtol=1e-6)
    assert jnp.allclose(kl, ref_kl, atol=1e-6, rtol=1e-6), (kl, ref_kl)
    assert cr.shape == (n_chosen,) and rjr.shape == (n_rejected,)

    print("KERNEL_OK")
</pallas_src>

<mosaic_0001>
module attributes {stable_mosaic.version = 11 : i64} {
  func.func @_kto_kernel(%arg0: memref<1x128xf32, #tpu.memory_space<vmem>>, %arg1: memref<1x128xf32, #tpu.memory_space<vmem>>, %arg2: memref<1x128xf32, #tpu.memory_space<vmem>>, %arg3: memref<1x128xf32, #tpu.memory_space<vmem>>, %arg4: memref<1x128xf32, #tpu.memory_space<vmem>>) attributes {dimension_semantics = [], scalar_prefetch = 0 : i64, scratch_operands = 0 : i64, tpu.core_type = #tpu.core_type<tc>} {
    %c0 = arith.constant 0 : index
    %c0_0 = arith.constant 0 : index
    %0 = vector.load %arg2[%c0, %c0_0] : memref<1x128xf32, #tpu.memory_space<vmem>>, vector<1x128xf32>
    %1 = tpu.iota {dimensions = array<i32: 0>} : vector<1x128xi32>
    %2 = tpu.iota {dimensions = array<i32: 1>} : vector<1x128xi32>
    %c128_i32 = arith.constant 128 : i32
    %3 = vector.broadcast %c128_i32 : i32 to vector<1x128xi32>
    %4 = arith.muli %1, %3 : vector<1x128xi32>
    %5 = arith.addi %4, %2 : vector<1x128xi32>
    %c8_i32 = arith.constant 8 : i32
    %6 = vector.broadcast %c8_i32 : i32 to vector<1x128xi32>
    %7 = arith.cmpi slt, %5, %6 : vector<1x128xi32>
    %cst = arith.constant 1.000000e+00 : f32
    %cst_1 = arith.constant -1.000000e+00 : f32
    %8 = vector.broadcast %cst : f32 to vector<1x128xf32>
    %9 = vector.broadcast %cst_1 : f32 to vector<1x128xf32>
    %10 = arith.select %7, %8, %9 : vector<1x128xi1>, vector<1x128xf32>
    %11 = arith.mulf %10, %0 : vector<1x128xf32>
    %12 = vector.shape_cast %11 : vector<1x128xf32> to vector<1x1x128xf32>
    %cst_2 = arith.constant dense<0.000000e+00> : vector<1xf32>
    %13 = vector.multi_reduction <add>, %12, %cst_2 [1, 2] : vector<1x1x128xf32> to vector<1xf32>
    %14 = vector.shape_cast %13 : vector<1xf32> to vector<1x1x1xf32>
    %15 = vector.extract %14[0, 0, 0] : f32 from vector<1x1x1xf32>
    %16 = vector.broadcast %15 : f32 to vector<1x1xf32>
    %cst_3 = arith.constant 8.000000e+00 : f32
    %17 = vector.broadcast %cst_3 : f32 to vector<1x1xf32>
    %18 = arith.divf %16, %17 : vector<1x1xf32>
    %cst_4 = arith.constant 0.000000e+00 : f32
    %19 = vector.broadcast %cst_4 : f32 to vector<1x1xf32>
    %20 = arith.maximumf %18, %19 : vector<1x1xf32>
    %c0_5 = arith.constant 0 : index
    %c0_6 = arith.constant 0 : index
    %21 = vector.load %arg0[%c0_5, %c0_6] : memref<1x128xf32, #tpu.memory_space<vmem>>, vector<1x128xf32>
    %c0_7 = arith.constant 0 : index
    %c0_8 = arith.constant 0 : index
    %22 = vector.load %arg1[%c0_7, %c0_8] : memref<1x128xf32, #tpu.memory_space<vmem>>, vector<1x128xf32>
    %23 = arith.subf %21, %22 : vector<1x128xf32>
    %cst_9 = arith.constant 1.000000e-01 : f32
    %24 = vector.broadcast %cst_9 : f32 to vector<1x128xf32>
    %25 = arith.mulf %24, %23 : vector<1x128xf32>
    %c0_10 = arith.constant 0 : index
    %c0_11 = arith.constant 0 : index
    %26 = vector.load %arg3[%c0_10, %c0_11] : memref<1x128xf32, #tpu.memory_space<vmem>>, vector<1x128xf32>
    tpu.vector_store %arg3[%c0_10, %c0_11], %25 {strides = array<i32>} : memref<1x128xf32, #tpu.memory_space<vmem>>, vector<1x128xf32>,
    %27 = tpu.iota {dimensions = array<i32: 0>} : vector<1x128xi32>
    %28 = tpu.iota {dimensions = array<i32: 1>} : vector<1x128xi32>
    %c128_i32_12 = arith.constant 128 : i32
    %29 = vector.broadcast %c128_i32_12 : i32 to vector<1x128xi32>
    %30 = arith.muli %27, %29 : vector<1x128xi32>
    %31 = arith.addi %30, %28 : vector<1x128xi32>
    %c4_i32 = arith.constant 4 : i32
    %32 = vector.broadcast %c4_i32 : i32 to vector<1x128xi32>
    %33 = arith.cmpi slt, %31, %32 : vector<1x128xi32>
    %c4_i32_13 = arith.constant 4 : i32
    %34 = vector.broadcast %c4_i32_13 : i32 to vector<1x128xi32>
    %35 = arith.cmpi sge, %31, %34 : vector<1x128xi32>
    %c8_i32_14 = arith.constant 8 : i32
    %36 = vector.broadcast %c8_i32_14 : i32 to vector<1x128xi32>
    %37 = arith.cmpi slt, %31, %36 : vector<1x128xi32>
    %38 = arith.andi %35, %37 : vector<1x128xi1>
    %cst_15 = arith.constant -1.000000e+00 : f32
    %cst_16 = arith.constant 1.000000e+00 : f32
    %39 = vector.broadcast %cst_15 : f32 to vector<1x128xf32>
    %40 = vector.broadcast %cst_16 : f32 to vector<1x128xf32>
    %41 = arith.select %33, %39, %40 : vector<1x128xi1>, vector<1x128xf32>
    %cst_17 = arith.constant 1.000000e+00 : f32
    %cst_18 = arith.constant 0.000000e+00 : f32
    %42 = vector.broadcast %cst_17 : f32 to vector<1x128xf32>
    %43 = vector.broadcast %cst_18 : f32 to vector<1x128xf32>
    %44 = arith.select %38, %42, %43 : vector<1x128xi1>, vector<1x128xf32>
    %cst_19 = arith.constant 1.330000e+00 : f32
    %45 = vector.broadcast %cst_19 : f32 to vector<1x128xf32>
    %46 = arith.select %33, %45, %44 : vector<1x128xi1>, vector<1x128xf32>
    %47 = vector.broadcast %20 : vector<1x1xf32> to vector<1x128xf32>
    %48 = arith.subf %23, %47 : vector<1x128xf32>
    %cst_20 = arith.constant 1.000000e-01 : f32
    %49 = vector.broadcast %cst_20 : f32 to vector<1x128xf32>
    %50 = arith.mulf %49, %48 : vector<1x128xf32>
    %51 = arith.mulf %41, %50 : vector<1x128xf32>
    %52 = math.absf %51 : vector<1x128xf32>
    %cst_21 = arith.constant 0.000000e+00 : f32
    %53 = vector.broadcast %cst_21 : f32 to vector<1x128xf32>
    %54 = arith.subf %53, %52 : vector<1x128xf32>
    %55 = math.exp %54 : vector<1x128xf32>
    %cst_22 = arith.constant 1.000000e+00 : f32
    %56 = vector.broadcast %cst_22 : f32 to vector<1x128xf32>
    %57 = arith.addf %56, %55 : vector<1x128xf32>
    %cst_23 = arith.constant 1.000000e+00 : f32
    %58 = vector.broadcast %cst_23 : f32 to vector<1x128xf32>
    %59 = arith.divf %58, %57 : vector<1x128xf32>
    %cst_24 = arith.constant 0.000000e+00 : f32
    %60 = vector.broadcast %cst_24 : f32 to vector<1x128xf32>
    %61 = arith.cmpf oge, %51, %60 : vector<1x128xf32>
    %cst_25 = arith.constant 1.000000e+00 : f32
    %62 = vector.broadcast %cst_25 : f32 to vector<1x128xf32>
    %63 = arith.subf %62, %59 : vector<1x128xf32>
    %64 = arith.select %61, %59, %63 : vector<1x128xi1>, vector<1x128xf32>
    %65 = arith.mulf %46, %64 : vector<1x128xf32>
    %66 = vector.shape_cast %65 : vector<1x128xf32> to vector<1x1x128xf32>
    %cst_26 = arith.constant dense<0.000000e+00> : vector<1xf32>
    %67 = vector.multi_reduction <add>, %66, %cst_26 [1, 2] : vector<1x1x128xf32> to vector<1xf32>
    %68 = vector.shape_cast %67 : vector<1xf32> to vector<1x1x1xf32>
    %69 = vector.extract %68[0, 0, 0] : f32 from vector<1x1x1xf32>
    %70 = vector.broadcast %69 : f32 to vector<1x1xf32>
    %cst_27 = arith.constant 8.000000e+00 : f32
    %71 = vector.broadcast %cst_27 : f32 to vector<1x1xf32>
    %72 = arith.divf %70, %71 : vector<1x1xf32>
    %73 = tpu.iota {dimensions = array<i32: 1>} : vector<1x128xi32>
    %c0_i32 = arith.constant 0 : i32
    %74 = vector.broadcast %c0_i32 : i32 to vector<1x128xi32>
    %75 = arith.cmpi eq, %73, %74 : vector<1x128xi32>
    %c1_i32 = arith.constant 1 : i32
    %76 = vector.broadcast %c1_i32 : i32 to vector<1x128xi32>
    %77 = arith.cmpi eq, %73, %76 : vector<1x128xi32>
    %cst_28 = arith.constant 0.000000e+00 : f32
    %78 = vector.shape_cast %20 : vector<1x1xf32> to vector<1x1xf32>
    %79 = vector.broadcast %78 : vector<1x1xf32> to vector<1x128xf32>
    %80 = vector.broadcast %cst_28 : f32 to vector<1x128xf32>
    %81 = arith.select %77, %79, %80 : vector<1x128xi1>, vector<1x128xf32>
    %82 = vector.shape_cast %72 : vector<1x1xf32> to vector<1x1xf32>
    %83 = vector.broadcast %82 : vector<1x1xf32> to vector<1x128xf32>
    %84 = arith.select %75, %83, %81 : vector<1x128xi1>, vector<1x128xf32>
    %c0_29 = arith.constant 0 : index
    %c0_30 = arith.constant 0 : index
    %85 = vector.load %arg4[%c0_29, %c0_30] : memref<1x128xf32, #tpu.memory_space<vmem>>, vector<1x128xf32>
    tpu.vector_store %arg4[%c0_29, %c0_30], %84 {strides = array<i32>} : memref<1x128xf32, #tpu.memory_space<vmem>>, vector<1x128xf32>,
    return
  }
}

</mosaic_0001>

<bundles_post_ra>
// kernel: tpu_custom_call.1
= control target key start
LH: loop header
LB: loop body
LE: loop exit
PB: predicated region body
PF: predicated region fallthrough
CT: control target
= control target key end

     0   :  { %10 = vsyncpa [#allocation3], 0  ;;  %s263_s0 = inlined_call_operand.hbm [shape: f32[1,128], index: 0, kind: input, shape index: {}]   ;;  %s264_s1 = inlined_call_operand.vmem [shape: f32[1,128], index: 1, kind: input, shape index: {}]   ;;  %s265_s2 = inlined_call_operand.vmem [shape: f32[1,128], index: 2, kind: input, shape index: {}]   ;;  %s266_s3 = inlined_call_operand.hbm [shape: f32[1,128], index: 3, kind: output, shape index: {0}]   ;;  %s267_s4 = inlined_call_operand.hbm [shape: f32[1,128], index: 4, kind: output, shape index: {1}]  }
   0x1   :  { %11 = vsyncpa [#allocation4], 0 }
   0x2   :  { %12 = vsyncpa [#allocation7], 0  ;;  %s206_s15 = smov [#allocation2]  }
   0x3   :  { %s19_s16 = sshll.u32 %s206_s15, 4  ;;  %s20_s16 = int_to_ptr.vmem [resolvable:$true] %s19_s16 }
   0x4   :  { %s148_s17 = scalar_lea.vmem %s20_s16, 16  ;;  %s152_s18 = scalar_lea.vmem %s20_s16, 32 }
   0x5   :  { %p149_p0 = scmp.ne.s32.totalorder %s20_s16, %s148_s17  ;;  %p153_p1 = scmp.lt.s32.totalorder %s20_s16, %s20_s16 }
   0x6   :  { %p154_p2 = scmp.lt.s32.totalorder %s152_s18, %s148_s17 }
   0x8   :  { %p155_p3 = por %p154_p2, %p153_p1 }
   0xa   :  { %p156_p4 = pnand %p155_p3, %p149_p0 }
   0xc   :  { %159 = shalt.err (!%p156_p4)
}
   0xd   :  { %22 = dma.hbm_to_vmem [thread:$0]  %s263_s0, 16, %s20_s16, [#allocation3]  }
   0xe   :  { %200 = dma.done.wait [#allocation3], 16  }
   0xf   :  { %201 = vsyncadd [#allocation3], 4294967280  ;;  %v31_v0 = vlaneseq  ;;  %v30_v5 = vld [vmem:[%s265_s2] sm:$0x1]  ;;  %v207_v6 = vmov -1.0   ;;  %vm40_vm1 = vcmask 1040384  }
  0x10   :  { %v55_v17 = vld [vmem:[#allocation2] sm:$0x1]  ;;  %v208_v24 = vmov 1.0   ;;  %v209_v33 = vmov 0.0  }
  0x11   :  { %v32_v1 = vshrl.u32 %v31_v0, 7  ;;  %v240_v2 = vand.u32 127, %v31_v0  ;;  %v56_v18 = vld [vmem:[%s264_s1] sm:$0x1]  ;;  %s210_s1 = smov [#allocation5]  }
  0x12   :  { %v57_v21 = vsub.f32 %v55_v17, %v56_v18  ;;  %s103_s24 = sshll.u32 %s210_s1, 4  ;;  %s104_s24 = int_to_ptr.vmem [resolvable:$true] %s103_s24 }
  0x13   :  { %v35_v3 = vmul.u32 128, %v32_v1  ;;  %s160_s25 = scalar_lea.vmem %s104_s24, 16  ;;  %s164_s26 = scalar_lea.vmem %s104_s24, 32 }
  0x14   :  { %v58_v41 = vmul.f32 0.1, %v57_v21  ;;  %p161_p5 = scmp.ne.s32.totalorder %s104_s24, %s160_s25  ;;  %p165_p6 = scmp.lt.s32.totalorder %s104_s24, %s104_s24 }
  0x15   :  { %v36_v4 = vadd.s32 %v35_v3, %v240_v2  ;;  %p166_p7 = scmp.lt.s32.totalorder %s164_s26, %s160_s25 }
  0x16   :  { %59 = vst [vmem:[#allocation5] sm:$0x1] %v58_v41 }
  0x17   :  { %vm37_vm0 = vcmp.lt.s32.totalorder %v36_v4, 8  ;;  %vm60_vm2 = vcmp.lt.s32.totalorder %v36_v4, 4  ;;  %vm61_vm3 = vcmp.ge.s32.totalorder %v36_v4, 4  ;;  %p167_p8 = por %p166_p7, %p165_p6 }
  0x18   :  { %v38_v7 = vsel %vm37_vm0, 1.0, %v207_v6  ;;  %v63_v25 = vsel %vm60_vm2, -1.0, %v208_v24  ;;  %vm62_vm4 = vmand %vm61_vm3, %vm37_vm0 }
  0x19   :  { %v39_v8 = vmul.f32 %v38_v7, %v30_v5  ;;  %v64_v34 = vsel %vm62_vm4, 1.0, %v209_v33  ;;  %p168_p9 = pnand %p167_p8, %p161_p5 }
  0x1a   :  { %v65_v36 = vsel %vm60_vm2, 1.33, %v64_v34 }
  0x1b   :  { %v41_v9 = vsel %vm40_vm1, %v39_v8, 0.0 }
  0x1c   :  { %42 = vadd.xlane.f32.xlu0 %v41_v9 }
  0xa5   :  { %v43_v10 = vpop.xlane.xlu0 %42 }
  0xa6   :  { %v44_v11 = vrot.slane %v43_v10, 4 }
  0xa8   :  { %v45_v12 = vadd.f32 %v44_v11, %v43_v10 }
  0xaa   :  { %v46_v13 = vrot.slane %v45_v12, 2 }
  0xac   :  { %v47_v14 = vadd.f32 %v46_v13, %v45_v12 }
  0xae   :  { %v48_v15 = vrot.slane %v47_v14, 1 }
  0xb0   :  { %v49_v16 = vadd.f32 %v48_v15, %v47_v14 }
  0xb2   :  { %126 = vpush %v49_v16 }
  0xe3   :  { %s127_s23 = spop %126 }
  0xe4   :  { %v51_v19 = vstv %s127_s23 }
  0xe5   :  { %v53_v20 = vmul.f32 0.125, %v51_v19 }
  0xe7   :  { %v54_v22 = vmax.f32 %v53_v20, 0.0 }
  0xe9   :  { %v66_v23 = vsub.f32 %v57_v21, %v54_v22 }
  0xeb   :  { %v67_v26 = vmul.f32 0.1, %v66_v23 }
  0xed   :  { %v68_v27 = vmul.f32 %v67_v26, %v63_v25 }
  0xef   :  { %v69_v28 = vand.u32 2147483647, %v68_v27  ;;  %vm76_vm5 = vcmp.ge.f32.partialorder %v68_v27, 0.0 }
  0xf1   :  { %v70_v29 = vsub.f32 0.0, %v69_v28 }
  0xf3   :  { %v71_v30 = vmul.f32 1.442695, %v70_v29 }
  0xf5   :  { %136 = vpow2.f32 %v71_v30 }
 0x102   :  { %v137_v31 = vpop.eup %136 }
 0x103   :  { %v73_v32 = vadd.f32 1.0, %v137_v31 }
 0x105   :  { %138 = vrcp.f32 %v73_v32 }
 0x112   :  { %v139_v35 = vpop.eup %138 }
 0x113   :  { %v77_v37 = vsub.f32 1.0, %v139_v35 }
 0x115   :  { %v78_v38 = vsel %vm76_vm5, %v139_v35, %v77_v37 }
 0x116   :  { %v79_v39 = vmul.f32 %v78_v38, %v65_v36 }
 0x118   :  { %v80_v40 = vsel %vm40_vm1, %v79_v39, 0.0 }
 0x119   :  { %81 = vadd.xlane.f32.xlu0 %v80_v40 }
 0x11a   :  { %171 = shalt.err (!%p168_p9)
}
 0x11b   :  { %106 = dma.vmem_to_hbm [thread:$0]  %s104_s24, 16, %s266_s3, [#allocation4]   ;;  %vm93_vm6 = vcmp.eq.s32.totalorder %v240_v2, 1  ;;  %vm92_vm7 = vcmp.eq.s32.totalorder %v240_v2, 0 }
 0x11c   :  { %s211_s30 = smov [#allocation6]   ;;  %v94_v51 = vsel %vm93_vm6, %v54_v22, 0.0 }
 0x11d   :  { %s113_s5 = sshll.u32 %s211_s30, 4  ;;  %s114_s5 = int_to_ptr.vmem [resolvable:$true] %s113_s5 }
 0x11e   :  { %s180_s3 = scalar_lea.vmem %s114_s5, 16  ;;  %s184_s6 = scalar_lea.vmem %s114_s5, 32 }
 0x11f   :  { %p181_p10 = scmp.ne.s32.totalorder %s114_s5, %s180_s3  ;;  %p185_p11 = scmp.lt.s32.totalorder %s114_s5, %s114_s5 }
 0x120   :  { %p186_p12 = scmp.lt.s32.totalorder %s184_s6, %s180_s3 }
 0x122   :  { %p187_p13 = por %p186_p12, %p185_p11 }
 0x124   :  { %p188_p0 = pnand %p187_p13, %p181_p10 }
 0x1a2   :  { %v82_v42 = vpop.xlane.xlu0 %81 }
 0x1a3   :  { %v83_v43 = vrot.slane %v82_v42, 4 }
 0x1a5   :  { %v84_v44 = vadd.f32 %v83_v43, %v82_v42 }
 0x1a7   :  { %v85_v45 = vrot.slane %v84_v44, 2 }
 0x1a9   :  { %v86_v46 = vadd.f32 %v85_v45, %v84_v44 }
 0x1ab   :  { %v87_v47 = vrot.slane %v86_v46, 1 }
 0x1ad   :  { %v88_v48 = vadd.f32 %v87_v47, %v86_v46 }
 0x1af   :  { %128 = vpush %v88_v48 }
 0x1e0   :  { %s129_s29 = spop %128 }
 0x1e1   :  { %v90_v49 = vstv %s129_s29 }
 0x1e2   :  { %v91_v50 = vmul.f32 0.125, %v90_v49 }
 0x1e4   :  { %v95_v52 = vsel %vm92_vm7, %v91_v50, %v94_v51 }
 0x1e5   :  { %96 = vst [vmem:[#allocation6] sm:$0x1] %v95_v52 }
 0x1e6   :  { %191 = shalt.err (!%p188_p0)
}
 0x1e7   :  { %116 = dma.vmem_to_hbm [thread:$0]  %s114_s5, 16, %s267_s4, [#allocation7]  }
 0x1e8   :  { %202 = dma.done.wait [#allocation4], 16  }
 0x1e9   :  { %203 = vsyncadd [#allocation4], 4294967280 }
 0x1ea   :  { %204 = dma.done.wait [#allocation7], 16  }
 0x1eb   :  { %205 = vsyncadd [#allocation7], 4294967280 }
 0x1ec   :  { %123 = vsyncpa [#allocation3], 1 }
 0x1ed   :  { %124 = vsyncpa [#allocation4], 1 }
 0x1ee   :  { %125 = vsyncpa [#allocation7], 1 }

</bundles_post_ra>
